<compile_context>
chip_gen: v6e
topology: v6e:2x2x1
jax: 0.10.0
libtpu: 0.0.40
codegen_flags: <defaults>
</compile_context>

<pallas_src>
import functools

import jax
import jax.numpy as jnp
from jax.experimental import pallas as pl
from jax.experimental.pallas import tpu as pltpu


def _round_up(x, m):
    return ((x + m - 1) // m) * m


def rhofm_kernel(theta0_ref, half_theta2_ref, item_ref, user_ref,
                 embs_t_ref, theta1_ref, ssum_ref, out_ref):
    """Fused RHOFM scoring for one row-tile of (item, user).

    theta0_ref, half_theta2_ref : SMEM (1, 1) scalars (half_theta2 = 0.5*theta2)
    item_ref, user_ref          : VMEM (TN, F) feature tiles (f32 or bf16)
    embs_t_ref                  : VMEM (d, F)  transposed embeddings (resident)
    theta1_ref                  : VMEM (d, 1)  order-1 coefficients (resident)
    ssum_ref                    : VMEM (1, F)  rowsum(embs^2) (resident)
    out_ref                     : VMEM (1, 1, TN) lane-dense scores for this tile
    """
    # Upcast streamed inputs to f32 before VPU elementwise work (v5e has no
    # bf16 VPU; cast is a no-op when inputs are already f32).
    item = item_ref[...].astype(jnp.float32)     # (TN, F)
    user = user_ref[...].astype(jnp.float32)     # (TN, F)

    su = item + user                             # x @ [e;e] == (item+user) @ e
    sq = item * item + user * user               # for the (x^2 @ w^2) fold

    embs_t = embs_t_ref[...]                     # (d, F), f32

    # (x @ w)^T = embs^T @ (item + user)^T  -> (d, TN); A @ B^T (q@k^T pattern)
    xw_t = jax.lax.dot_general(
        embs_t, su, dimension_numbers=(((1,), (1,)), ((), ())),
        preferred_element_type=jnp.float32)      # (d, TN)

    half_t2 = half_theta2_ref[0, 0]              # 0.5 * theta2
    t1 = theta1_ref[...]                         # (d, 1)

    # theta1 . xw  +  0.5*theta2 * ||xw||^2   fused into ONE sublane reduction:
    #   sum_d( xw_d * (theta1_d + 0.5*theta2 * xw_d) )
    lin_pair1 = jnp.sum(xw_t * (t1 + half_t2 * xw_t),
                        axis=0, keepdims=True)   # (1, TN)

    # sum_d (x^2 @ w^2)_d == (item^2 + user^2) @ rowsum(embs^2)
    pair2 = jax.lax.dot_general(
        ssum_ref[...], sq, dimension_numbers=(((1,), (1,)), ((), ())),
        preferred_element_type=jnp.float32)      # (1, TN)

    theta0 = theta0_ref[0, 0]
    out_ref[0] = theta0 + lin_pair1 - half_t2 * pair2


def _auto_tile_rows(n, F, d, elt_bytes):
    """Row-tile size chosen by bytes-per-step and a VMEM budget."""
    F_pad = _round_up(F, 128)                    # lane padding in VMEM
    # ~1 MiB of streamed item+user HBM traffic per grid step (amortizes the
    # ~0.35us per-step pipeline overhead; >=512 KiB goal on v5e/v6e).
    target_hbm_bytes = 1 << 20
    tn_hbm = max(128, target_hbm_bytes // (2 * F * elt_bytes))
    # VMEM budget (<= ~20 MiB): item/user landing buffers x2 pipeline buffers
    # (lane-padded), plus f32 in-kernel intermediates (su, sq, xw_t, temps).
    vmem_budget = 20 << 20
    per_row_vmem = 4 * F_pad * elt_bytes + (2 * F_pad + 2 * d + 16) * 4
    tn_vmem = max(128, vmem_budget // per_row_vmem)
    tn = min(tn_hbm, tn_vmem, 8192)

    if n >= 256:
        # Ensure >= 2 grid steps so ("parallel",) can shard across v7x's 2 TCs.
        tn = min(tn, _round_up(pl.cdiv(n, 2), 128))
        tn = max(128, (tn // 128) * 128)         # lane-dense unmasked stores
    else:
        # Tiny inputs: single tile; block extents equal the (padded) array
        # extents, so sub-128 lane widths stay legal.
        tn = _round_up(max(n, 1), 8)
    return tn


@functools.partial(jax.jit, static_argnames=("tile_rows", "input_dtype"))
def rhofm_forward(item, user, embs, theta0, theta1, theta2, *,
                  tile_rows=None, input_dtype=jnp.float32):
    """item, user: (n, F); embs: (F, d); theta0: (1,1); theta1: (d,1); theta2: (1,1)."""
    n, F = item.shape
    Fe, d = embs.shape
    assert Fe == F
    assert theta2.shape == (1, 1)  # m == 2 branch only (order == 2)

    elt_bytes = jnp.dtype(input_dtype).itemsize
    item = item.astype(input_dtype)
    user = user.astype(input_dtype)
    embs = embs.astype(jnp.float32)

    if tile_rows is None:
        tn = _auto_tile_rows(n, F, d, elt_bytes)
    else:
        tn = max(8, (int(tile_rows) // 8) * 8)
    num_tiles = pl.cdiv(n, tn)

    # Tiny precomputations (negligible HBM traffic; embs is F x d and resident).
    # embs.T is kept in the wrapper (one tiny transpose) so the in-kernel MXU
    # matmul is the plain A @ B^T pattern.
    embs_t = embs.T                                      # (d, F)
    ssum = jnp.sum(embs * embs, axis=1)[None, :]         # (1, F) = rowsum(embs^2)
    theta0 = theta0.reshape(1, 1).astype(jnp.float32)
    half_theta2 = (0.5 * theta2).reshape(1, 1).astype(jnp.float32)
    theta1 = theta1.reshape(d, 1).astype(jnp.float32)

    cost = pl.CostEstimate(
        flops=int(2 * n * F * d + 2 * n * F + 8 * n * max(F, d)),
        transcendentals=0,
        bytes_accessed=int(2 * n * F * elt_bytes + 4 * n + 4 * F * d
                           + 4 * (d + F + 3)),
    )

    out = pl.pallas_call(
        rhofm_kernel,
        out_shape=jax.ShapeDtypeStruct((num_tiles, 1, tn), jnp.float32),
        grid=(num_tiles,),
        in_specs=[
            pl.BlockSpec((1, 1), lambda i: (0, 0),
                         memory_space=pltpu.MemorySpace.SMEM),   # theta0
            pl.BlockSpec((1, 1), lambda i: (0, 0),
                         memory_space=pltpu.MemorySpace.SMEM),   # 0.5*theta2
            pl.BlockSpec((tn, F), lambda i: (i, 0)),             # item row tile
            pl.BlockSpec((tn, F), lambda i: (i, 0)),             # user row tile
            pl.BlockSpec((d, F), lambda i: (0, 0)),              # embs^T (resident)
            pl.BlockSpec((d, 1), lambda i: (0, 0)),              # theta1 (resident)
            pl.BlockSpec((1, F), lambda i: (0, 0)),              # rowsum(embs^2)
        ],
        out_specs=pl.BlockSpec((1, 1, tn), lambda i: (i, 0, 0)),
        compiler_params=pltpu.CompilerParams(
            dimension_semantics=("parallel",),
            vmem_limit_bytes=32 * 1024 * 1024),
        cost_estimate=cost,
    )(theta0, half_theta2, item, user, embs_t, theta1, ssum)

    # Lane-dense (num_tiles, 1, tn) -> (n, 1); garbage columns of the ragged
    # last tile are sliced off here (rows are fully independent).
    return out.reshape(num_tiles * tn)[:n].reshape(n, 1)


def rhofm_reference(item, user, embs, theta0, theta1, theta2):
    """Pure-JAX reference mirroring the PyTorch forward (linear structure, m=2)."""
    x = jnp.concatenate([item, user], axis=-1)
    w = jnp.concatenate([embs, embs], axis=0)
    xw = x @ w
    out = theta0 + xw @ theta1
    out_pair1 = jnp.sum(xw ** 2, axis=1, keepdims=True)
    out_pair2 = jnp.sum((x ** 2) @ (w ** 2), axis=1, keepdims=True)
    return out + 0.5 * theta2 * (out_pair1 - out_pair2)


if __name__ == "__main__":
    # Small shapes consistent with the module: n samples, F features, d embedding dim.
    n, F, d = 8, 16, 32
    order = 2  # => theta2 has shape (order-1, 1) = (1, 1); m == 2 branch

    key = jax.random.PRNGKey(0)
    k_item, k_user, k_embs, k_t0, k_t1, k_t2 = jax.random.split(key, 6)

    item = jax.random.normal(k_item, (n, F), dtype=jnp.float32)
    user = jax.random.normal(k_user, (n, F), dtype=jnp.float32)
    embs = jax.random.normal(k_embs, (F, d), dtype=jnp.float32)

    # frozen=False: theta* ~ randn (deterministic via PRNGKey(0) splits)
    theta0 = jax.random.normal(k_t0, (1, 1), dtype=jnp.float32)
    theta1 = jax.random.normal(k_t1, (d, 1), dtype=jnp.float32)
    theta2 = jax.random.normal(k_t2, (order - 1, 1), dtype=jnp.float32)

    out = jax.block_until_ready(
        rhofm_forward(item, user, embs, theta0, theta1, theta2))
    ref = rhofm_reference(item, user, embs, theta0, theta1, theta2)
    assert out.shape == (n, 1), out.shape
    # Looser tolerance than exact-op-order match: the kernel folds the sums
    # algebraically, so f32 accumulation order differs from the reference.
    assert jnp.allclose(out, ref, rtol=1e-3, atol=5e-3), (out, ref)

    # Second check: auto tiling with a multi-tile grid and a ragged last tile.
    n2 = 300
    k_i2, k_u2 = jax.random.split(jax.random.PRNGKey(1), 2)
    item2 = jax.random.normal(k_i2, (n2, F), dtype=jnp.float32)
    user2 = jax.random.normal(k_u2, (n2, F), dtype=jnp.float32)
    out2 = jax.block_until_ready(
        rhofm_forward(item2, user2, embs, theta0, theta1, theta2))
    ref2 = rhofm_reference(item2, user2, embs, theta0, theta1, theta2)
    assert out2.shape == (n2, 1), out2.shape
    assert jnp.allclose(out2, ref2, rtol=1e-3, atol=5e-3)

    # Third check: explicit small tile override (3 tiles, ragged last tile).
    out3 = jax.block_until_ready(
        rhofm_forward(item2, user2, embs, theta0, theta1, theta2,
                      tile_rows=128))
    assert out3.shape == (n2, 1), out3.shape
    assert jnp.allclose(out3, ref2, rtol=1e-3, atol=5e-3)

    print("KERNEL_OK")
</pallas_src>

<mosaic_0001>
module attributes {stable_mosaic.version = 11 : i64} {
  func.func @rhofm_kernel(%arg0: i32, %arg1: memref<1x1xf32, #tpu.memory_space<smem>>, %arg2: memref<1x1xf32, #tpu.memory_space<smem>>, %arg3: memref<8x16xf32, #tpu.memory_space<vmem>>, %arg4: memref<8x16xf32, #tpu.memory_space<vmem>>, %arg5: memref<32x16xf32, #tpu.memory_space<vmem>>, %arg6: memref<32x1xf32, #tpu.memory_space<vmem>>, %arg7: memref<1x16xf32, #tpu.memory_space<vmem>>, %arg8: memref<1x1x8xf32, #tpu.memory_space<vmem>>) attributes {dimension_semantics = [#tpu.dimension_semantics<parallel>], iteration_bounds = array<i64: 1>, scalar_prefetch = 0 : i64, scratch_operands = 0 : i64, tpu.core_type = #tpu.core_type<tc>, window_params = [{transform_indices = @transform_0, window_bounds = array<i64: 1, 1>}, {transform_indices = @transform_1, window_bounds = array<i64: 1, 1>}, {transform_indices = @transform_2, window_bounds = array<i64: 8, 16>}, {transform_indices = @transform_3, window_bounds = array<i64: 8, 16>}, {pipeline_mode = #tpu.pipeline_mode<synchronous>, transform_indices = @transform_4, window_bounds = array<i64: 32, 16>}, {pipeline_mode = #tpu.pipeline_mode<synchronous>, transform_indices = @transform_5, window_bounds = array<i64: 32, 1>}, {pipeline_mode = #tpu.pipeline_mode<synchronous>, transform_indices = @transform_6, window_bounds = array<i64: 1, 16>}, {transform_indices = @transform_7, window_bounds = array<i64: 1, 1, 8>}]} {
    %c0 = arith.constant 0 : index
    %c0_0 = arith.constant 0 : index
    %0 = vector.load %arg3[%c0, %c0_0] : memref<8x16xf32, #tpu.memory_space<vmem>>, vector<8x16xf32>
    %c0_1 = arith.constant 0 : index
    %c0_2 = arith.constant 0 : index
    %1 = vector.load %arg4[%c0_1, %c0_2] : memref<8x16xf32, #tpu.memory_space<vmem>>, vector<8x16xf32>
    %2 = arith.addf %0, %1 : vector<8x16xf32>
    %3 = arith.mulf %0, %0 : vector<8x16xf32>
    %4 = arith.mulf %1, %1 : vector<8x16xf32>
    %5 = arith.addf %3, %4 : vector<8x16xf32>
    %c0_3 = arith.constant 0 : index
    %c0_4 = arith.constant 0 : index
    %6 = vector.load %arg5[%c0_3, %c0_4] : memref<32x16xf32, #tpu.memory_space<vmem>>, vector<32x16xf32>
    %cst = arith.constant dense<0.000000e+00> : vector<32x8xf32>
    %7 = tpu.matmul %6, %2, %cst {dimension_numbers = #tpu.dot_dimension_numbers<[1], [1], [0], [0], [0, 0, 1, 0], [], []>} : vector<32x16xf32>, vector<8x16xf32>, vector<32x8xf32> -> vector<32x8xf32>
    %c0_5 = arith.constant 0 : index
    %c0_6 = arith.constant 0 : index
    %8 = memref.load %arg2[%c0_5, %c0_6] : memref<1x1xf32, #tpu.memory_space<smem>>
    %c0_7 = arith.constant 0 : index
    %c0_8 = arith.constant 0 : index
    %9 = vector.load %arg6[%c0_7, %c0_8] : memref<32x1xf32, #tpu.memory_space<vmem>>, vector<32x1xf32>
    %10 = vector.broadcast %8 : f32 to vector<32x8xf32>
    %11 = arith.mulf %10, %7 : vector<32x8xf32>
    %12 = vector.broadcast %9 : vector<32x1xf32> to vector<32x8xf32>
    %13 = arith.addf %12, %11 : vector<32x8xf32>
    %14 = arith.mulf %7, %13 : vector<32x8xf32>
    %cst_9 = arith.constant dense<0.000000e+00> : vector<8xf32>
    %15 = vector.multi_reduction <add>, %14, %cst_9 [0] : vector<32x8xf32> to vector<8xf32>
    %16 = vector.shape_cast %15 : vector<8xf32> to vector<1x8xf32>
    %c0_10 = arith.constant 0 : index
    %c0_11 = arith.constant 0 : index
    %17 = vector.load %arg7[%c0_10, %c0_11] : memref<1x16xf32, #tpu.memory_space<vmem>>, vector<1x16xf32>
    %cst_12 = arith.constant dense<0.000000e+00> : vector<1x8xf32>
    %18 = tpu.matmul %17, %5, %cst_12 {dimension_numbers = #tpu.dot_dimension_numbers<[1], [1], [0], [0], [0, 0, 1, 0], [], []>} : vector<1x16xf32>, vector<8x16xf32>, vector<1x8xf32> -> vector<1x8xf32>
    %c0_13 = arith.constant 0 : index
    %c0_14 = arith.constant 0 : index
    %19 = memref.load %arg1[%c0_13, %c0_14] : memref<1x1xf32, #tpu.memory_space<smem>>
    %20 = vector.broadcast %19 : f32 to vector<1x8xf32>
    %21 = arith.addf %20, %16 : vector<1x8xf32>
    %22 = vector.broadcast %8 : f32 to vector<1x8xf32>
    %23 = arith.mulf %22, %18 : vector<1x8xf32>
    %24 = arith.subf %21, %23 : vector<1x8xf32>
    %c0_15 = arith.constant 0 : index
    %c0_16 = arith.constant 0 : index
    %c0_17 = arith.constant 0 : index
    %25 = vector.load %arg8[%c0_15, %c0_16, %c0_17] : memref<1x1x8xf32, #tpu.memory_space<vmem>>, vector<1x1x8xf32>
    %26 = vector.shape_cast %25 : vector<1x1x8xf32> to vector<1x8xf32>
    %27 = vector.shape_cast %24 : vector<1x8xf32> to vector<1x1x8xf32>
    tpu.vector_store %arg8[%c0_15, %c0_16, %c0_17], %27 {strides = array<i32>} : memref<1x1x8xf32, #tpu.memory_space<vmem>>, vector<1x1x8xf32>,
    return
  }
  func.func @transform_0(%arg0: i32) -> (i32, i32) {
    %c0_i32 = arith.constant 0 : i32
    %c0_i32_0 = arith.constant 0 : i32
    %c0_i32_1 = arith.constant 0 : i32
    return %c0_i32, %c0_i32_0 : i32, i32
  }
  func.func @transform_1(%arg0: i32) -> (i32, i32) {
    %c0_i32 = arith.constant 0 : i32
    %c0_i32_0 = arith.constant 0 : i32
    %c0_i32_1 = arith.constant 0 : i32
    return %c0_i32, %c0_i32_0 : i32, i32
  }
  func.func @transform_2(%arg0: i32) -> (i32, i32) {
    %c0_i32 = arith.constant 0 : i32
    %c0_i32_0 = arith.constant 0 : i32
    return %arg0, %c0_i32 : i32, i32
  }
  func.func @transform_3(%arg0: i32) -> (i32, i32) {
    %c0_i32 = arith.constant 0 : i32
    %c0_i32_0 = arith.constant 0 : i32
    return %arg0, %c0_i32 : i32, i32
  }
  func.func @transform_4(%arg0: i32) -> (i32, i32) {
    %c0_i32 = arith.constant 0 : i32
    %c0_i32_0 = arith.constant 0 : i32
    %c0_i32_1 = arith.constant 0 : i32
    return %c0_i32, %c0_i32_0 : i32, i32
  }
  func.func @transform_5(%arg0: i32) -> (i32, i32) {
    %c0_i32 = arith.constant 0 : i32
    %c0_i32_0 = arith.constant 0 : i32
    %c0_i32_1 = arith.constant 0 : i32
    return %c0_i32, %c0_i32_0 : i32, i32
  }
  func.func @transform_6(%arg0: i32) -> (i32, i32) {
    %c0_i32 = arith.constant 0 : i32
    %c0_i32_0 = arith.constant 0 : i32
    %c0_i32_1 = arith.constant 0 : i32
    return %c0_i32, %c0_i32_0 : i32, i32
  }
  func.func @transform_7(%arg0: i32) -> (i32, i32, i32) {
    %c0_i32 = arith.constant 0 : i32
    %c0_i32_0 = arith.constant 0 : i32
    %c0_i32_1 = arith.constant 0 : i32
    return %arg0, %c0_i32, %c0_i32_0 : i32, i32, i32
  }
}

</mosaic_0001>

<bundles_post_ra>
// kernel: rhofm_forward.1
= control target key start
LH: loop header
LB: loop body
LE: loop exit
PB: predicated region body
PF: predicated region fallthrough
CT: control target
= control target key end

     0   :  { %vm39_vm0 = vcmask 130048   ;;  %v345_v6 = vmov 0.0   ;;  %vm346_vm1 = vmmov 0   ;;  %v347_v7 = vmov 0   ;;  %s439_s0 = inlined_call_operand.<no memory space> [shape: f32[1,1], index: 0, kind: input, shape index: {}]   ;;  %s440_s1 = inlined_call_operand.<no memory space> [shape: f32[1,1], index: 1, kind: input, shape index: {}]   ;;  %s441_s2 = inlined_call_operand.vmem [shape: f32[8,16], index: 2, kind: input, shape index: {}]   ;;  %s442_s3 = inlined_call_operand.vmem [shape: f32[8,16], index: 3, kind: input, shape index: {}]   ;;  %s443_s4 = inlined_call_operand.vmem [shape: f32[32,16], index: 4, kind: input, shape index: {}]   ;;  %s444_s5 = inlined_call_operand.vmem [shape: f32[32,1], index: 5, kind: input, shape index: {}]   ;;  %s445_s6 = inlined_call_operand.vmem [shape: f32[1,16], index: 6, kind: input, shape index: {}]   ;;  %s446_s7 = inlined_call_operand.hbm [shape: f32[1,1,8], index: 7, kind: output, shape index: {}]  }
   0x1   :  { %v29_v0 = vld [vmem:[%s441_s2] sm:$0xff]  ;;  %312 = vmatprep.subr.mxu1 %v345_v6  ;;  %314 = vmatprep.mubr.msk.f32.mxu1 %vm346_vm1, %v345_v6  ;;  %v143_v9 = vld [vmem:[%s444_s5 + $0x10] sm:$0xff] }
   0x2   :  { %v30_v1 = vld [vmem:[%s442_s3] sm:$0xff]  ;;  %v32_v4 = vmul.f32 %v29_v0, %v29_v0  ;;  %321 = vset.pattern.permute.xlu0 %v347_v7 }
   0x3   :  { %v35_v2 = vld [vmem:[%s443_s4] sm:$0xff]  ;;  %v31_v3 = vadd.f32 %v30_v1, %v29_v0  ;;  %v33_v5 = vmul.f32 %v30_v1, %v30_v1 }
   0x4   :  { %306 = vmatprep.mubr.msk.f32.mxu0 %vm39_vm0, %v35_v2  ;;  %v141_v8 = vld [vmem:[%s444_s5] sm:$0xff] }
   0x5   :  { %304 = vmatprep.subr.msk.mxu0 %vm39_vm0, %v31_v3  ;;  %v34_v10 = vadd.f32 %v33_v5, %v32_v4  ;;  %152 = vperm.xlu0 %321, %v141_v8  }
   0x6   :  { %14 = vsyncpa [#allocation5], 0  ;;  %305 = vmatpush3.xpose.msk.msra.mxu0 %vm39_vm0, %v31_v3  ;;  %v36_v11 = vld [vmem:[%s443_s4 + $0x8] sm:$0xff]  ;;  %322 = vset.pattern.permute.xlu1 %v347_v7  ;;  %v37_v13 = vld [vmem:[%s443_s4 + $0x10] sm:$0xff]  ;;  %v145_v18 = vstv %s440_s1  ;;  %vm178_vm2 = vcmask 64512   ;;  %v270_v52 = vstv %s439_s0  ;;  %vm274_vm3 = vcmask 57344  }
   0x7   :  { %v142_v12 = vld [vmem:[%s444_s5 + $0x8] sm:$0xff]  ;;  %313 = vmatpush3.xpose.msk.msra.mxu1 %vm39_vm0, %v34_v10  ;;  %v192_v14 = vld [vmem:[%s445_s6] sm:$0x1]  ;;  %162 = vperm.xlu1 %322, %v143_v9   ;;  %v144_v15 = vld [vmem:[%s444_s5 + $0x18] sm:$0xff]  ;;  %s348_s5 = smov [#allocation4]  }
   0x8   :  { %v38_v16 = vld [vmem:[%s443_s4 + $0x18] sm:$0xff]  ;;  %s282_s22 = sshll.u32 %s348_s5, 4  ;;  %s283_s22 = int_to_ptr.vmem [resolvable:$true] %s282_s22 }
   0x9   :  { %307 = vmatmul.mubr.msk.f32.vlgmr.msra.gmra.mxu0 %vm39_vm0, %v36_v11  ;;  %157 = vperm.xlu0 %321, %v142_v12   ;;  %s323_s23 = scalar_lea.vmem %s283_s22, 16  ;;  %s327_s24 = scalar_lea.vmem %s283_s22, 32 }
   0xa   :  { %309 = vmatprep.mubr.msk.f32.mxu0 %vm39_vm0, %v37_v13  ;;  %315 = vmatmul.mubr.msk.f32.vlgmr.msra.gmra.mxu1 %vm39_vm0, %v192_v14  ;;  %p324_p0 = scmp.ne.s32.totalorder %s283_s22, %s323_s23  ;;  %p328_p1 = scmp.lt.s32.totalorder %s283_s22, %s283_s22 }
   0xb   :  { %167 = vperm.xlu1 %322, %v144_v15   ;;  %p329_p2 = scmp.lt.s32.totalorder %s327_s24, %s323_s23 }
   0xd   :  { %310 = vmatmul.mubr.msk.f32.gmra.mxu0 %vm39_vm0, %v38_v16  ;;  %p330_p3 = por %p329_p2, %p328_p1 }
   0xf   :  { %p331_p4 = pnand %p330_p3, %p324_p0 }
  0x80   :  { %v153_v17 = vpop.permute.xlu0 %152 }
  0x82   :  { %v163_v19 = vpop.permute.xlu1 %162 }
  0x84   :  { %v158_v21 = vpop.permute.xlu0 %157 }
  0x86   :  { %v168_v29 = vpop.permute.xlu1 %167 }
  0xc9   :  { %v308_v20 = vpop.f32.mrf.mxu0 }
  0xca   :  { %v147_v22 = vmul.f32 %v308_v20, %v145_v18  ;;  %v265_v23 = vpop.f32.mrf.mxu1 }
  0xcb   :  { %v121_v24 = vpop.f32.mrf.mxu0  ;;  %v272_v54 = vmul.f32 %v265_v23, %v145_v18 }
  0xcc   :  { %v171_v25 = vadd.f32 %v158_v21, %v147_v22  ;;  %v146_v26 = vmul.f32 %v145_v18, %v121_v24  ;;  %v316_v27 = vpop.f32.mrf.mxu1 }
  0xcd   :  { %v311_v28 = vpop.f32.mrf.mxu0 }
  0xce   :  { %v170_v30 = vadd.f32 %v153_v17, %v146_v26  ;;  %v149_v31 = vmul.f32 %v311_v28, %v145_v18  ;;  %v175_v33 = vmul.f32 %v308_v20, %v171_v25 }
  0xcf   :  { %v131_v32 = vpop.f32.mrf.mxu0 }
  0xd0   :  { %v174_v34 = vmul.f32 %v170_v30, %v121_v24  ;;  %v173_v35 = vadd.f32 %v168_v29, %v149_v31  ;;  %v148_v36 = vmul.f32 %v145_v18, %v131_v32  ;;  %v180_v39 = vsel %vm178_vm2, %v175_v33, 0.0 }
  0xd2   :  { %v179_v37 = vsel %vm178_vm2, %v174_v34, 0.0  ;;  %v172_v38 = vadd.f32 %v163_v19, %v148_v36  ;;  %v177_v40 = vmul.f32 %v311_v28, %v173_v35 }
  0xd3   :  { %v181_v42 = vadd.f32 %v180_v39, %v179_v37 }
  0xd4   :  { %v176_v41 = vmul.f32 %v172_v38, %v131_v32  ;;  %v184_v45 = vsel %vm178_vm2, %v177_v40, 0.0 }
  0xd6   :  { %v182_v43 = vsel %vm178_vm2, %v176_v41, 0.0 }
  0xd7   :  { %v183_v44 = vadd.f32 %v182_v43, %v181_v42 }
  0xd9   :  { %v185_v46 = vadd.f32 %v184_v45, %v183_v44 }
  0xdb   :  { %v186_v47 = vrot.slane %v185_v46, 4 }
  0xdd   :  { %v187_v48 = vadd.f32 %v186_v47, %v185_v46 }
  0xdf   :  { %v188_v49 = vrot.slane %v187_v48, 2 }
  0xe1   :  { %v189_v50 = vadd.f32 %v188_v49, %v187_v48 }
  0xe3   :  { %v190_v51 = vrot.slane %v189_v50, 1 }
  0xe5   :  { %v191_v53 = vadd.f32 %v190_v51, %v189_v50 }
  0xe7   :  { %v271_v55 = vadd.f32 %v270_v52, %v191_v53 }
  0xe9   :  { %v273_v56 = vsub.f32 %v271_v55, %v272_v54 }
  0xeb   :  { %275 = vst.msk [vmem:[#allocation4] sm:$0x1] %vm274_vm3, %v273_v56 }
  0xec   :  { %334 = shalt.err (!%p331_p4)
}
  0xed   :  { %285 = dma.vmem_to_hbm [thread:$0]  %s283_s22, 16, %s446_s7, [#allocation5]  }
  0xee   :  { %343 = dma.done.wait [#allocation5], 16  }
  0xef   :  { %344 = vsyncadd [#allocation5], 4294967280 }
  0xf0   :  { %289 = vsyncpa [#allocation5], 1 }

</bundles_post_ra>
